<compile_context>
chip_gen: v5e
topology: v5e:2x2
jax: 0.10.0
libtpu: 0.0.40
codegen_flags: <defaults>
</compile_context>

<pallas_src>
import functools

import jax
import jax.numpy as jnp
from jax.experimental import pallas as pl
from jax.experimental.pallas import tpu as pltpu

HIDDEN = 64
LANE = 128          # lane width the weight/output columns are padded to
SUB = 8             # f32 sublane group
BN_EPS = 1e-5


def _round_up(n, m):
    return ((n + m - 1) // m) * m


def _bn_relu(h, gamma, beta):
    # Training-mode BatchNorm1d over the batch axis, biased variance, all f32.
    # Centered (two-pass) variance for numerical robustness; the extra XLU reduction
    # is free in the overhead-bound regime.
    inv_n = jnp.float32(1.0 / h.shape[0])           # true batch size (no padded rows)
    mu = jnp.sum(h, axis=0, keepdims=True) * inv_n
    d = h - mu
    var = jnp.sum(d * d, axis=0, keepdims=True) * inv_n
    scale = gamma * jax.lax.rsqrt(var + BN_EPS)     # gamma folded into the scale
    return jnp.maximum(d * scale + beta, 0.0)


def anet_kernel(x_ref, slab_ref, o_ref, *, s_sub):
    # slab layout (rows):
    #   [0          , s_sub        ) : w1   (s_sub, 128)   -- only :HIDDEN cols used
    #   [s_sub      , s_sub+128    ) : w2   (128, 128)
    #   [s_sub+128  , s_sub+256    ) : w3   (128, 128)
    #   [s_sub+256  , s_sub+264    ) : params: g1, be1, g2, be2, b3 (one row each)
    x = x_ref[...]                                   # (B, s_sub) f32

    w1 = slab_ref[0:s_sub, :]
    w2 = slab_ref[s_sub:s_sub + LANE, :]
    w3 = slab_ref[s_sub + LANE:s_sub + 2 * LANE, :]
    p = slab_ref[s_sub + 2 * LANE:s_sub + 2 * LANE + SUB, :]

    g1, be1 = p[0:1, :], p[1:2, :]
    g2, be2 = p[2:3, :], p[3:4, :]
    b3 = p[4:5, :]

    # fc1 (+ bn1 + relu) -- linear bias cancelled by BN mean subtraction
    h = jnp.dot(x, w1, preferred_element_type=jnp.float32)
    h = _bn_relu(h, g1, be1)

    # fc2 (+ bn2 + relu)
    h = jnp.dot(h, w2, preferred_element_type=jnp.float32)
    h = _bn_relu(h, g2, be2)

    # out + tanh (padded output columns have zero weights/bias -> tanh(0) = 0)
    y = jnp.dot(h, w3, preferred_element_type=jnp.float32) + b3
    o_ref[...] = jnp.tanh(y)                         # lane-dense (B, 128) store


@functools.partial(jax.jit, static_argnames=("a_dim",))
def anet_forward(x, slab, *, a_dim):
    """x: (B, s_dim) f32, slab: packed params -> (B, a_dim) f32."""
    B, s_dim = x.shape
    s_sub = slab.shape[0] - (2 * LANE + SUB)
    if s_dim != s_sub:
        # Only hit when s_dim is not a multiple of 8 (never for the demo s_dim=32).
        x = jnp.pad(x, ((0, 0), (0, s_sub - s_dim)))

    flops = 2 * B * (s_sub * LANE + LANE * LANE + LANE * LANE)
    transcendentals = B * LANE + 2 * LANE            # tanh rows + 2x rsqrt rows
    bytes_accessed = 4 * (x.size + slab.size + B * LANE)

    vmem = pl.BlockSpec(memory_space=pltpu.VMEM)
    out = pl.pallas_call(
        functools.partial(anet_kernel, s_sub=s_sub),
        out_shape=jax.ShapeDtypeStruct((B, LANE), jnp.float32),  # lane-dense store
        in_specs=[vmem, vmem],                       # exactly 2 input DMAs: x + slab
        out_specs=vmem,
        cost_estimate=pl.CostEstimate(
            flops=flops,
            transcendentals=transcendentals,
            bytes_accessed=bytes_accessed,
        ),
    )(x, slab)
    return out[:, :a_dim]


def init_params(key, s_dim, a_dim):
    """Raw (un-padded) params mirroring ANet.__init__ shapes/init."""
    k1, k2, k3, k4, k5, k6 = jax.random.split(key, 6)

    def linear_init(kw, kb, fan_in, fan_out):
        bound = 1.0 / jnp.sqrt(jnp.float32(fan_in))
        w = jax.random.uniform(kw, (fan_in, fan_out), jnp.float32, -bound, bound)
        b = jax.random.uniform(kb, (1, fan_out), jnp.float32, -bound, bound)
        return w, b

    w1, b1 = linear_init(k1, k2, s_dim, HIDDEN)
    w2, b2 = linear_init(k3, k4, HIDDEN, HIDDEN)
    # out.weight.data.uniform_(-0.003, 0.003); bias keeps default init
    w3 = jax.random.uniform(k5, (HIDDEN, a_dim), jnp.float32, -0.003, 0.003)
    b3_bound = 1.0 / jnp.sqrt(jnp.float32(HIDDEN))
    b3 = jax.random.uniform(k6, (1, a_dim), jnp.float32, -b3_bound, b3_bound)

    g1 = jnp.ones((1, HIDDEN), jnp.float32)
    be1 = jnp.zeros((1, HIDDEN), jnp.float32)
    g2 = jnp.ones((1, HIDDEN), jnp.float32)
    be2 = jnp.zeros((1, HIDDEN), jnp.float32)

    return dict(w1=w1, b1=b1, g1=g1, be1=be1,
                w2=w2, b2=b2, g2=g2, be2=be2,
                w3=w3, b3=b3)


def pack_params(raw, s_dim, a_dim):
    """One-time: pack EVERYTHING into a single lane-dense f32 slab (one DMA).

    Rows: [w1 (s_sub,128)] [w2 (128,128)] [w3 (128,128)] [g1,be1,g2,be2,b3 (8,128)].
    Zero padding in unused lanes keeps padded hidden/output columns exactly zero.
    b1/b2 intentionally dropped: training-mode BN subtracts them out exactly.
    """
    s_sub = _round_up(s_dim, SUB)
    slab = jnp.zeros((s_sub + 2 * LANE + SUB, LANE), jnp.float32)
    slab = slab.at[:s_dim, :HIDDEN].set(raw["w1"])
    slab = slab.at[s_sub:s_sub + HIDDEN, :HIDDEN].set(raw["w2"])
    slab = slab.at[s_sub + LANE:s_sub + LANE + HIDDEN, :a_dim].set(raw["w3"])
    base = s_sub + 2 * LANE
    slab = slab.at[base + 0, :HIDDEN].set(raw["g1"][0])   # gamma1
    slab = slab.at[base + 1, :HIDDEN].set(raw["be1"][0])  # beta1
    slab = slab.at[base + 2, :HIDDEN].set(raw["g2"][0])   # gamma2
    slab = slab.at[base + 3, :HIDDEN].set(raw["be2"][0])  # beta2
    slab = slab.at[base + 4, :a_dim].set(raw["b3"][0])    # out bias
    return slab


def anet_reference(x, raw):
    """Pure-JAX reference with the original (bias-including) formulation."""
    def bn_relu(h, g, b):
        mu = h.mean(0, keepdims=True)
        var = ((h - mu) ** 2).mean(0, keepdims=True)
        return jnp.maximum((h - mu) / jnp.sqrt(var + BN_EPS) * g + b, 0.0)

    h = x @ raw["w1"] + raw["b1"]
    h = bn_relu(h, raw["g1"], raw["be1"])
    h = h @ raw["w2"] + raw["b2"]
    h = bn_relu(h, raw["g2"], raw["be2"])
    return jnp.tanh(h @ raw["w3"] + raw["b3"])


if __name__ == "__main__":
    key = jax.random.PRNGKey(0)
    k_x, k_p = jax.random.split(key)

    B, S_DIM, A_DIM = 8, 32, 4
    x = jax.random.normal(k_x, (B, S_DIM), jnp.float32)
    raw = init_params(k_p, S_DIM, A_DIM)
    slab = pack_params(raw, S_DIM, A_DIM)

    out = anet_forward(x, slab, a_dim=A_DIM)
    jax.block_until_ready(out)

    ref = anet_reference(x, raw)

    assert out.shape == (B, A_DIM)
    assert bool(jnp.all(jnp.isfinite(out)))
    assert bool(jnp.all(jnp.abs(out) <= 1.0))          # tanh range
    assert bool(jnp.allclose(out, ref, atol=1e-4, rtol=1e-4))

    print("KERNEL_OK")
</pallas_src>

<mosaic_0001>
module attributes {stable_mosaic.version = 11 : i64} {
  func.func @anet_kernel(%arg0: memref<8x32xf32, #tpu.memory_space<vmem>>, %arg1: memref<296x128xf32, #tpu.memory_space<vmem>>, %arg2: memref<8x128xf32, #tpu.memory_space<vmem>>) attributes {dimension_semantics = [], scalar_prefetch = 0 : i64, scratch_operands = 0 : i64, tpu.core_type = #tpu.core_type<tc>} {
    %c0 = arith.constant 0 : index
    %c0_0 = arith.constant 0 : index
    %0 = vector.load %arg0[%c0, %c0_0] : memref<8x32xf32, #tpu.memory_space<vmem>>, vector<8x32xf32>
    %c0_1 = arith.constant 0 : index
    %c0_2 = arith.constant 0 : index
    %1 = vector.load %arg1[%c0_1, %c0_2] : memref<296x128xf32, #tpu.memory_space<vmem>>, vector<32x128xf32>
    %c32 = arith.constant 32 : index
    %c0_3 = arith.constant 0 : index
    %2 = vector.load %arg1[%c32, %c0_3] : memref<296x128xf32, #tpu.memory_space<vmem>>, vector<128x128xf32>
    %c160 = arith.constant 160 : index
    %c0_4 = arith.constant 0 : index
    %3 = vector.load %arg1[%c160, %c0_4] : memref<296x128xf32, #tpu.memory_space<vmem>>, vector<128x128xf32>
    %c288 = arith.constant 288 : index
    %c0_5 = arith.constant 0 : index
    %4 = vector.load %arg1[%c288, %c0_5] : memref<296x128xf32, #tpu.memory_space<vmem>>, vector<8x128xf32>
    %5 = vector.extract_strided_slice %4 {offsets = [0, 0], sizes = [1, 128], strides = [1, 1]} : vector<8x128xf32> to vector<1x128xf32>
    %6 = vector.extract_strided_slice %4 {offsets = [1, 0], sizes = [1, 128], strides = [1, 1]} : vector<8x128xf32> to vector<1x128xf32>
    %7 = vector.extract_strided_slice %4 {offsets = [2, 0], sizes = [1, 128], strides = [1, 1]} : vector<8x128xf32> to vector<1x128xf32>
    %8 = vector.extract_strided_slice %4 {offsets = [3, 0], sizes = [1, 128], strides = [1, 1]} : vector<8x128xf32> to vector<1x128xf32>
    %9 = vector.extract_strided_slice %4 {offsets = [4, 0], sizes = [1, 128], strides = [1, 1]} : vector<8x128xf32> to vector<1x128xf32>
    %cst = arith.constant dense<0.000000e+00> : vector<8x128xf32>
    %10 = tpu.matmul %0, %1, %cst {dimension_numbers = #tpu.dot_dimension_numbers<[1], [0], [0], [1], [0, 0, 1, 1], [], []>} : vector<8x32xf32>, vector<32x128xf32>, vector<8x128xf32> -> vector<8x128xf32>
    %cst_6 = arith.constant dense<0.000000e+00> : vector<128xf32>
    %11 = vector.multi_reduction <add>, %10, %cst_6 [0] : vector<8x128xf32> to vector<128xf32>
    %12 = vector.shape_cast %11 : vector<128xf32> to vector<1x128xf32>
    %cst_7 = arith.constant 1.250000e-01 : f32
    %13 = vector.broadcast %cst_7 : f32 to vector<1x128xf32>
    %14 = arith.mulf %12, %13 : vector<1x128xf32>
    %15 = vector.broadcast %14 : vector<1x128xf32> to vector<8x128xf32>
    %16 = arith.subf %10, %15 : vector<8x128xf32>
    %17 = arith.mulf %16, %16 : vector<8x128xf32>
    %cst_8 = arith.constant dense<0.000000e+00> : vector<128xf32>
    %18 = vector.multi_reduction <add>, %17, %cst_8 [0] : vector<8x128xf32> to vector<128xf32>
    %19 = vector.shape_cast %18 : vector<128xf32> to vector<1x128xf32>
    %cst_9 = arith.constant 1.250000e-01 : f32
    %20 = vector.broadcast %cst_9 : f32 to vector<1x128xf32>
    %21 = arith.mulf %19, %20 : vector<1x128xf32>
    %cst_10 = arith.constant 9.99999974E-6 : f32
    %22 = vector.broadcast %cst_10 : f32 to vector<1x128xf32>
    %23 = arith.addf %21, %22 : vector<1x128xf32>
    %24 = math.rsqrt %23 : vector<1x128xf32>
    %25 = arith.mulf %5, %24 : vector<1x128xf32>
    %26 = vector.broadcast %25 : vector<1x128xf32> to vector<8x128xf32>
    %27 = arith.mulf %16, %26 : vector<8x128xf32>
    %28 = vector.broadcast %6 : vector<1x128xf32> to vector<8x128xf32>
    %29 = arith.addf %27, %28 : vector<8x128xf32>
    %cst_11 = arith.constant 0.000000e+00 : f32
    %30 = vector.broadcast %cst_11 : f32 to vector<8x128xf32>
    %31 = arith.maximumf %29, %30 : vector<8x128xf32>
    %cst_12 = arith.constant dense<0.000000e+00> : vector<8x128xf32>
    %32 = tpu.matmul %31, %2, %cst_12 {dimension_numbers = #tpu.dot_dimension_numbers<[1], [0], [0], [1], [0, 0, 1, 1], [], []>} : vector<8x128xf32>, vector<128x128xf32>, vector<8x128xf32> -> vector<8x128xf32>
    %cst_13 = arith.constant dense<0.000000e+00> : vector<128xf32>
    %33 = vector.multi_reduction <add>, %32, %cst_13 [0] : vector<8x128xf32> to vector<128xf32>
    %34 = vector.shape_cast %33 : vector<128xf32> to vector<1x128xf32>
    %cst_14 = arith.constant 1.250000e-01 : f32
    %35 = vector.broadcast %cst_14 : f32 to vector<1x128xf32>
    %36 = arith.mulf %34, %35 : vector<1x128xf32>
    %37 = vector.broadcast %36 : vector<1x128xf32> to vector<8x128xf32>
    %38 = arith.subf %32, %37 : vector<8x128xf32>
    %39 = arith.mulf %38, %38 : vector<8x128xf32>
    %cst_15 = arith.constant dense<0.000000e+00> : vector<128xf32>
    %40 = vector.multi_reduction <add>, %39, %cst_15 [0] : vector<8x128xf32> to vector<128xf32>
    %41 = vector.shape_cast %40 : vector<128xf32> to vector<1x128xf32>
    %cst_16 = arith.constant 1.250000e-01 : f32
    %42 = vector.broadcast %cst_16 : f32 to vector<1x128xf32>
    %43 = arith.mulf %41, %42 : vector<1x128xf32>
    %cst_17 = arith.constant 9.99999974E-6 : f32
    %44 = vector.broadcast %cst_17 : f32 to vector<1x128xf32>
    %45 = arith.addf %43, %44 : vector<1x128xf32>
    %46 = math.rsqrt %45 : vector<1x128xf32>
    %47 = arith.mulf %7, %46 : vector<1x128xf32>
    %48 = vector.broadcast %47 : vector<1x128xf32> to vector<8x128xf32>
    %49 = arith.mulf %38, %48 : vector<8x128xf32>
    %50 = vector.broadcast %8 : vector<1x128xf32> to vector<8x128xf32>
    %51 = arith.addf %49, %50 : vector<8x128xf32>
    %cst_18 = arith.constant 0.000000e+00 : f32
    %52 = vector.broadcast %cst_18 : f32 to vector<8x128xf32>
    %53 = arith.maximumf %51, %52 : vector<8x128xf32>
    %cst_19 = arith.constant dense<0.000000e+00> : vector<8x128xf32>
    %54 = tpu.matmul %53, %3, %cst_19 {dimension_numbers = #tpu.dot_dimension_numbers<[1], [0], [0], [1], [0, 0, 1, 1], [], []>} : vector<8x128xf32>, vector<128x128xf32>, vector<8x128xf32> -> vector<8x128xf32>
    %55 = vector.broadcast %9 : vector<1x128xf32> to vector<8x128xf32>
    %56 = arith.addf %54, %55 : vector<8x128xf32>
    %57 = math.tanh %56 : vector<8x128xf32>
    %c0_20 = arith.constant 0 : index
    %c0_21 = arith.constant 0 : index
    %58 = vector.load %arg2[%c0_20, %c0_21] : memref<8x128xf32, #tpu.memory_space<vmem>>, vector<8x128xf32>
    tpu.vector_store %arg2[%c0_20, %c0_21], %57 {strides = array<i32>} : memref<8x128xf32, #tpu.memory_space<vmem>>, vector<8x128xf32>,
    return
  }
}

</mosaic_0001>

<bundles_post_ra>
// kernel: anet_forward.1
= control target key start
LH: loop header
LB: loop body
LE: loop exit
PB: predicated region body
PF: predicated region fallthrough
CT: control target
= control target key end

     0   :  { %7 = vsyncpa [#allocation3], 0  ;;  %s316_s0 = inlined_call_operand.hbm [shape: f32[8,32], index: 0, kind: input, shape index: {}]   ;;  %s317_s1 = inlined_call_operand.hbm [shape: f32[296,128], index: 1, kind: input, shape index: {}]   ;;  %s318_s2 = inlined_call_operand.vmem [shape: f32[8,128], index: 2, kind: output, shape index: {}]  }
   0x1   :  { %s14_s11 = sshll.u32 %s316_s0, 4  ;;  %s15_s11 = int_to_ptr.hbm [resolvable:$true] %s14_s11 }
   0x2   :  { %8 = vsyncpa [#allocation5], 0  ;;  %s281_s12 = smov [#allocation2]   ;;  %s24_s16 = sshll.u32 %s317_s1, 4  ;;  %s25_s16 = int_to_ptr.hbm [resolvable:$true] %s24_s16 }
   0x3   :  { %s16_s13 = sshll.u32 %s281_s12, 4  ;;  %s282_s17 = smov [#allocation4]   ;;  %s17_s13 = int_to_ptr.vmem [resolvable:$true] %s16_s13 }
   0x4   :  { %19 = dma.hbm_to_vmem [thread:$0]  %s15_s11, 128, %s17_s13, [#allocation3]  }
   0x5   :  { %s26_s18 = sshll.u32 %s282_s17, 4  ;;  %s283_s19 = smov 128   ;;  %s27_s18 = int_to_ptr.vmem [resolvable:$true] %s26_s18 }
   0x6   :  { %s284_s20 = smov 8  }
   0x7   :  { %32 = dma.hbm_to_vmem [thread:$0]  %s25_s16, 4736, %s27_s18, [#allocation5], %s283_s19, %s283_s19, %s284_s20  }
   0x8   :  { %277 = dma.done.wait [#allocation3], 128  }
   0x9   :  { %278 = vsyncadd [#allocation3], 4294967168 }
   0xa   :  { %279 = dma.done.wait [#allocation5], 4736  }
   0xb   :  { %280 = vsyncadd [#allocation5], 4294962560  ;;  %v45_v0 = vld [vmem:[#allocation4 + $0x18] sm:$0xff]  ;;  %v44_v1 = vld [vmem:[#allocation4 + $0x10] sm:$0xff]  ;;  %vm79_vm0 = vcmask 261120  }
   0xc   :  { %95 = vmatpush.msra.mxu0 %v45_v0  ;;  %v43_v2 = vld [vmem:[#allocation4 + $0x8] sm:$0xff]  ;;  %v42_v3 = vld [vmem:[#allocation4] sm:$0xff]  ;;  %v41_v4 = vld [vmem:[#allocation2] sm:$0xff] }
   0xd   :  { %v61_v5 = vld [vmem:[#allocation4 + $0x98] sm:$0xff]  ;;  %v60_v8 = vld [vmem:[#allocation4 + $0x90] sm:$0xff]  ;;  %v59_v10 = vld [vmem:[#allocation4 + $0x88] sm:$0xff] }
   0xe   :  { %96 = vmatpush.msra.mxu0 %v44_v1  ;;  %136 = vmatpush.msra.mxu1 %v61_v5  ;;  %v58_v12 = vld [vmem:[#allocation4 + $0x80] sm:$0xff]  ;;  %v57_v14 = vld [vmem:[#allocation4 + $0x78] sm:$0xff]  ;;  %v56_v16 = vld [vmem:[#allocation4 + $0x70] sm:$0xff] }
   0xf   :  { %v55_v18 = vld [vmem:[#allocation4 + $0x68] sm:$0xff]  ;;  %v54_v20 = vld [vmem:[#allocation4 + $0x60] sm:$0xff]  ;;  %v53_v22 = vld [vmem:[#allocation4 + $0x58] sm:$0xff] }
  0x10   :  { %97 = vmatpush.msra.mxu0 %v43_v2  ;;  %137 = vmatpush.msra.mxu1 %v60_v8  ;;  %v52_v24 = vld [vmem:[#allocation4 + $0x50] sm:$0xff]  ;;  %v51_v26 = vld [vmem:[#allocation4 + $0x48] sm:$0xff]  ;;  %v50_v28 = vld [vmem:[#allocation4 + $0x40] sm:$0xff] }
  0x11   :  { %v49_v30 = vld [vmem:[#allocation4 + $0x38] sm:$0xff]  ;;  %v48_v32 = vld [vmem:[#allocation4 + $0x30] sm:$0xff]  ;;  %v47_v33 = vld [vmem:[#allocation4 + $0x28] sm:$0xff] }
  0x12   :  { %98 = vmatpush.msra.mxu0 %v42_v3  ;;  %138 = vmatpush.msra.mxu1 %v59_v10  ;;  %v46_v35 = vld [vmem:[#allocation4 + $0x20] sm:$0xff]  ;;  %v77_v53 = vld [vmem:[#allocation4 + $0x118] sm:$0xff]  ;;  %v76_v56 = vld [vmem:[#allocation4 + $0x110] sm:$0xff] }
  0x13   :  { %218 = vmatmul.msk.f32.vlgmr.msra.gmra.mxu0 %vm79_vm0, %v41_v4  ;;  %v306_v44 = vld [vmem:[#allocation4 + $0x120] sm:$0xff]  ;;  %190 = vmatpush.msra.mxu2 %v77_v53  ;;  %v75_v58 = vld [vmem:[#allocation4 + $0x108] sm:$0xff]  ;;  %v73_v62 = vld [vmem:[#allocation4 + $0xf8] sm:$0xff] }
  0x14   :  { %139 = vmatpush.msra.mxu1 %v58_v12  ;;  %v133_v49 = vperm.slane %v306_v44, 1  ;;  %v74_v60 = vld [vmem:[#allocation4 + $0x100] sm:$0xff]  ;;  %v72_v0 = vld [vmem:[#allocation4 + $0xf0] sm:$0xff]  ;;  %v71_v2 = vld [vmem:[#allocation4 + $0xe8] sm:$0xff] }
  0x15   :  { %191 = vmatpush.msra.mxu2 %v76_v56  ;;  %v70_v4 = vld [vmem:[#allocation4 + $0xe0] sm:$0xff]  ;;  %v68_v8 = vld [vmem:[#allocation4 + $0xd0] sm:$0xff]  ;;  %v67_v10 = vld [vmem:[#allocation4 + $0xc8] sm:$0xff] }
  0x16   :  { %140 = vmatpush.msra.mxu1 %v57_v14  ;;  %v66_v12 = vld [vmem:[#allocation4 + $0xc0] sm:$0xff]  ;;  %v65_v14 = vld [vmem:[#allocation4 + $0xb8] sm:$0xff] }
  0x17   :  { %192 = vmatpush.msra.mxu2 %v75_v58 }
  0x18   :  { %141 = vmatpush.msra.mxu1 %v56_v16  ;;  %v64_v16 = vld [vmem:[#allocation4 + $0xb0] sm:$0xff] }
  0x19   :  { %193 = vmatpush.msra.mxu2 %v74_v60 }
  0x1a   :  { %142 = vmatpush.msra.mxu1 %v55_v18 }
  0x1b   :  { %194 = vmatpush.msra.mxu2 %v73_v62 }
  0x1c   :  { %143 = vmatpush.msra.mxu1 %v54_v20 }
  0x1d   :  { %195 = vmatpush.msra.mxu2 %v72_v0 }
  0x1e   :  { %144 = vmatpush.msra.mxu1 %v53_v22 }
  0x1f   :  { %196 = vmatpush.msra.mxu2 %v71_v2 }
  0x20   :  { %145 = vmatpush.msra.mxu1 %v52_v24 }
  0x21   :  { %197 = vmatpush.msra.mxu2 %v70_v4 }
  0x22   :  { %146 = vmatpush.msra.mxu1 %v51_v26 }
  0x24   :  { %147 = vmatpush.msra.mxu1 %v50_v28 }
  0x26   :  { %148 = vmatpush.msra.mxu1 %v49_v30 }
  0x28   :  { %149 = vmatpush.msra.mxu1 %v48_v32  ;;  %v186_v32 = vperm.slane %v306_v44, 3 }
  0x2a   :  { %150 = vmatpush.msra.mxu1 %v47_v33 }
  0x2c   :  { %151 = vmatpush.msra.mxu1 %v46_v35 }
  0x90   :  { %v100_v6 = vpop.f32.mrf.mxu0 }
  0x91   :  { %v103_v7 = vrot.slane %v100_v6, 4 }
  0x93   :  { %v104_v9 = vadd.f32 %v103_v7, %v100_v6 }
  0x95   :  { %v105_v11 = vrot.slane %v104_v9, 2 }
  0x97   :  { %v106_v13 = vadd.f32 %v105_v11, %v104_v9 }
  0x99   :  { %v107_v15 = vrot.slane %v106_v13, 1 }
  0x9b   :  { %v108_v17 = vadd.f32 %v107_v15, %v106_v13 }
  0x9d   :  { %v109_v19 = vmul.f32 0.125, %v108_v17  ;;  %v63_v17 = vld [vmem:[#allocation4 + $0xa8] sm:$0xff] }
  0x9f   :  { %v110_v21 = vsub.f32 %v100_v6, %v109_v19  ;;  %v69_v6 = vld [vmem:[#allocation4 + $0xd8] sm:$0xff]  ;;  %v62_v19 = vld [vmem:[#allocation4 + $0xa0] sm:$0xff] }
  0xa0   :  { %198 = vmatpush.msra.mxu2 %v69_v6 }
  0xa1   :  { %v111_v23 = vmul.f32 %v110_v21, %v110_v21 }
  0xa2   :  { %199 = vmatpush.msra.mxu2 %v68_v8 }
  0xa3   :  { %v112_v25 = vrot.slane %v111_v23, 4 }
  0xa4   :  { %200 = vmatpush.msra.mxu2 %v67_v10 }
  0xa5   :  { %v113_v27 = vadd.f32 %v112_v25, %v111_v23 }
  0xa6   :  { %201 = vmatpush.msra.mxu2 %v66_v12 }
  0xa7   :  { %v114_v29 = vrot.slane %v113_v27, 2 }
  0xa8   :  { %202 = vmatpush.msra.mxu2 %v65_v14 }
  0xa9   :  { %v115_v31 = vadd.f32 %v114_v29, %v113_v27 }
  0xaa   :  { %203 = vmatpush.msra.mxu2 %v64_v16 }
  0xab   :  { %v116_v34 = vrot.slane %v115_v31, 1 }
  0xac   :  { %204 = vmatpush.msra.mxu2 %v63_v17 }
  0xad   :  { %v117_v36 = vadd.f32 %v116_v34, %v115_v31 }
  0xae   :  { %205 = vmatpush.msra.mxu2 %v62_v19 }
  0xaf   :  { %v118_v37 = vmul.f32 0.125, %v117_v36  ;;  %v189_v36 = vperm.slane %v306_v44, 4 }
  0xb1   :  { %v119_v38 = vadd.f32 1e-05, %v118_v37 }
  0xb3   :  { %223 = vrsqrt.f32 %v119_v38  ;;  %vm126_vm2 = vweird.f32 %v119_v38 }
  0xb9   :  { %v224_v39 = vpop.eup %223 }
  0xba   :  { %v121_v40 = vmul.f32 %v224_v39, %v119_v38  ;;  %vm127_vm1 = vweird.f32 %v224_v39 }
  0xbb   :  { %vm128_vm3 = vmor %vm126_vm2, %vm127_vm1 }
  0xbc   :  { %v122_v41 = vmul.f32 %v224_v39, %v121_v40 }
  0xbe   :  { %v123_v42 = vmul.f32 0.5, %v122_v41 }
  0xc0   :  { %v124_v43 = vsub.f32 1.5, %v123_v42 }
  0xc2   :  { %v125_v45 = vmul.f32 %v224_v39, %v124_v43 }
  0xc4   :  { %v129_v46 = vsel %vm128_vm3, %v224_v39, %v125_v45 }
  0xc5   :  { %v130_v47 = vmul.f32 %v129_v46, %v306_v44 }
  0xc7   :  { %v131_v48 = vperm.slane %v130_v47, 0 }
  0xc9   :  { %v132_v50 = vmul.f32 %v131_v48, %v110_v21 }
  0xcb   :  { %v134_v51 = vadd.f32 %v133_v49, %v132_v50 }
  0xcd   :  { %v135_v52 = vmax.f32 %v134_v51, 0.0 }
  0xcf   :  { %152 = vmatmul.f32.vlgmr.msra.gmra.mxu1 %v135_v52 }
 0x14c   :  { %v153_v54 = vpop.f32.mrf.mxu1 }
 0x14d   :  { %v156_v55 = vrot.slane %v153_v54, 4 }
 0x14f   :  { %v157_v57 = vadd.f32 %v156_v55, %v153_v54 }
 0x151   :  { %v158_v59 = vrot.slane %v157_v57, 2 }
 0x153   :  { %v159_v61 = vadd.f32 %v158_v59, %v157_v57 }
 0x155   :  { %v160_v63 = vrot.slane %v159_v61, 1 }
 0x157   :  { %v161_v1 = vadd.f32 %v160_v63, %v159_v61 }
 0x159   :  { %v162_v3 = vmul.f32 0.125, %v161_v1 }
 0x15b   :  { %v163_v5 = vsub.f32 %v153_v54, %v162_v3 }
 0x15d   :  { %v164_v7 = vmul.f32 %v163_v5, %v163_v5 }
 0x15f   :  { %v165_v9 = vrot.slane %v164_v7, 4 }
 0x161   :  { %v166_v11 = vadd.f32 %v165_v9, %v164_v7 }
 0x163   :  { %v167_v13 = vrot.slane %v166_v11, 2 }
 0x165   :  { %v168_v15 = vadd.f32 %v167_v13, %v166_v11 }
 0x167   :  { %v169_v18 = vrot.slane %v168_v15, 1 }
 0x169   :  { %v170_v20 = vadd.f32 %v169_v18, %v168_v15 }
 0x16b   :  { %v171_v21 = vmul.f32 0.125, %v170_v20 }
 0x16d   :  { %v172_v22 = vadd.f32 1e-05, %v171_v21 }
 0x16f   :  { %225 = vrsqrt.f32 %v172_v22  ;;  %vm179_vm5 = vweird.f32 %v172_v22 }
 0x175   :  { %v226_v23 = vpop.eup %225 }
 0x176   :  { %v174_v24 = vmul.f32 %v226_v23, %v172_v22  ;;  %vm180_vm4 = vweird.f32 %v226_v23 }
 0x177   :  { %vm181_vm6 = vmor %vm179_vm5, %vm180_vm4 }
 0x178   :  { %v175_v25 = vmul.f32 %v226_v23, %v174_v24 }
 0x17a   :  { %v176_v26 = vmul.f32 0.5, %v175_v25 }
 0x17c   :  { %v177_v27 = vsub.f32 1.5, %v176_v26 }
 0x17e   :  { %v178_v28 = vmul.f32 %v226_v23, %v177_v27 }
 0x180   :  { %v182_v29 = vsel %vm181_vm6, %v226_v23, %v178_v28 }
 0x181   :  { %v183_v30 = vmul.f32 %v182_v29, %v306_v44 }
 0x183   :  { %v184_v31 = vperm.slane %v183_v30, 2 }
 0x185   :  { %v185_v33 = vmul.f32 %v184_v31, %v163_v5 }
 0x187   :  { %v187_v34 = vadd.f32 %v186_v32, %v185_v33 }
 0x189   :  { %v188_v35 = vmax.f32 %v187_v34, 0.0 }
 0x18b   :  { %206 = vmatmul.f32.vlgmr.msra.gmra.mxu2 %v188_v35 }
 0x20e   :  { %v207_v37 = vpop.f32.mrf.mxu2 }
 0x20f   :  { %v208_v38 = vadd.f32 %v207_v37, %v189_v36 }
 0x211   :  { %227 = vtanh.f32 %v208_v38 }
 0x217   :  { %v228_v39 = vpop.eup %227 }
 0x218   :  { %211 = vst [vmem:[%s318_s2] sm:$0xff] %v228_v39 }
 0x219   :  { %216 = vsyncpa [#allocation3], 1 }
 0x21a   :  { %217 = vsyncpa [#allocation5], 1 }

</bundles_post_ra>
